<compile_context>
chip_gen: v5e
topology: v5e:2x2
jax: 0.10.0
libtpu: 0.0.40
codegen_flags: <defaults>
</compile_context>

<pallas_src>
import functools
import math

import jax
import jax.numpy as jnp
from jax.experimental import pallas as pl
from jax.experimental.pallas import tpu as pltpu


def _round_up(x, m):
    return ((x + m - 1) // m) * m


def _vmem_budget():
    """(vmem_limit_bytes, usable budget) per core, sized from the chip."""
    try:
        cap = pltpu.get_tpu_info().vmem_capacity_bytes
    except Exception:
        cap = 64 * 1024 * 1024            # conservative (v7x) fallback
    limit = min(int(cap * 0.75), 112 * 1024 * 1024)
    return limit, int(limit * 0.85)


def _pick_adj_tile(n):
    # Largest of 512/256/128 that (a) keeps zero-padding waste <= ~25% and
    # (b) leaves >= 2 row tiles so both v7x TensorCores stay busy.
    for t in (512, 256, 128):
        n_pad = _round_up(n, t)
        if n_pad // t >= 2 and (n_pad - n) * 4 <= n:
            return t
    return 128


# --------------------------------------------------------------------------
# Kernel 1: support = x @ weight   (computed exactly once, row-tiled)
# --------------------------------------------------------------------------
def _xw_kernel(x_ref, w_ref, o_ref, *, cdt):
    # x_ref: [tm1, F_in_p], w_ref: [F_in_p, F_out_p] (full, resident),
    # o_ref: [tm1, F_out_p].  Inputs are cast to the compute dtype in VMEM so
    # no host-side cast/copy of x or w is needed for the bf16 path.
    o_ref[...] = jnp.dot(
        x_ref[...].astype(cdt), w_ref[...].astype(cdt),
        preferred_element_type=jnp.float32,
    ).astype(o_ref.dtype)


# --------------------------------------------------------------------------
# Kernel 2: out = adj @ support + bias   (K-tiled over the node dimension)
# --------------------------------------------------------------------------
def _adj_matmul_bias_kernel(adj_ref, s_ref, b_ref, o_ref, *, tk, cdt,
                            cast_adj, support_resident):
    # adj_ref: [tm, tk]  (stored dtype, cast to bf16 in VMEM when needed)
    # s_ref:   [N_pad, tn] resident slab  OR  [tk, tn] per-k tile
    # b_ref:   [1, tn] f32
    # o_ref:   [tm, tn] f32 -- block index (i, j) is constant across the k
    #          axis, so it stays VMEM-resident and doubles as the accumulator.
    k = pl.program_id(2)

    @pl.when(k == 0)
    def _():
        o_ref[...] = jnp.zeros_like(o_ref)

    a = adj_ref[...]
    if cast_adj:
        a = a.astype(cdt)
    if support_resident:
        s = s_ref[pl.ds(pl.multiple_of(k * tk, tk), tk), :]
    else:
        s = s_ref[...]
    o_ref[...] += jnp.dot(a, s, preferred_element_type=jnp.float32)

    @pl.when(k == pl.num_programs(2) - 1)
    def _():
        o_ref[...] += b_ref[...]          # bias added exactly once per tile


def graph_convolution(x, adj, weight, bias, *, compute_dtype=jnp.bfloat16):
    """GCN layer forward: adj @ (x @ weight) + bias (dense adjacency)."""
    N, f_in = x.shape
    f_out = weight.shape[1]
    assert adj.shape == (N, N)
    assert weight.shape[0] == f_in and bias.shape == (f_out,)

    cdt = jnp.dtype(compute_dtype)
    vmem_limit, vmem_budget = _vmem_budget()

    # ---- tile / shape selection ---------------------------------------------
    t = _pick_adj_tile(N)                 # adj tile: tm = tk = t
    np_ = _round_up(N, t)
    f_in_p = _round_up(f_in, 128)         # lane dim of x / sublane dim of w
    f_out_p = _round_up(f_out, 128)

    adj_isz = jnp.dtype(adj.dtype).itemsize
    cdt_isz = cdt.itemsize

    def _k2_vmem(tn, resident):
        sup = 2 * (np_ if resident else t) * tn * cdt_isz
        return (2 * t * t * adj_isz       # adj tiles (double-buffered)
                + 2 * t * tn * 4          # f32 output block (accumulator)
                + 2 * tn * 4              # bias
                + sup)

    # Keep tn = f_out_p (adj read exactly once) unless VMEM forces a split;
    # prefer a resident support slab (kills the per-i support refetch).
    tn_candidates = [f_out_p] + [c for c in (2048, 1024, 512, 256, 128)
                                 if c < f_out_p and f_out_p % c == 0]
    tn, support_resident = 128, False
    chosen = False
    for cand in tn_candidates:
        for resident in (True, False):
            if _k2_vmem(cand, resident) <= vmem_budget:
                tn, support_resident, chosen = cand, resident, True
                break
        if chosen:
            break

    # Kernel-1 row tile: largest of 512/256/128 dividing np_ that fits VMEM.
    tm1 = 128
    for cand in (512, 256, 128):
        k1_bytes = (2 * cand * f_in_p * x.dtype.itemsize
                    + 2 * f_in_p * f_out_p * weight.dtype.itemsize
                    + 2 * cand * f_out_p * cdt_isz)
        if np_ % cand == 0 and k1_bytes <= vmem_budget:
            tm1 = cand
            break

    # ---- host-side zero-padding only where a dimension is actually ragged ----
    # adj (the big operand) is passed through untouched whenever N is already
    # tile-aligned; its dtype cast happens inside the kernel.
    xp = x
    if (np_, f_in_p) != x.shape:
        xp = jnp.zeros((np_, f_in_p), x.dtype).at[:N, :f_in].set(x)
    wp = weight
    if (f_in_p, f_out_p) != weight.shape:
        wp = jnp.zeros((f_in_p, f_out_p), weight.dtype).at[:f_in, :f_out].set(weight)
    adjp = adj
    if np_ != N:
        adjp = jnp.zeros((np_, np_), adj.dtype).at[:N, :N].set(adj)
    bp = jnp.zeros((1, f_out_p), jnp.float32).at[0, :f_out].set(
        bias.astype(jnp.float32))

    # ---- kernel 1: support = x @ w (once; weight stays resident) -------------
    support = pl.pallas_call(
        functools.partial(_xw_kernel, cdt=cdt),
        out_shape=jax.ShapeDtypeStruct((np_, f_out_p), cdt),
        grid_spec=pltpu.PrefetchScalarGridSpec(
            num_scalar_prefetch=0,
            grid=(np_ // tm1,),
            in_specs=[
                pl.BlockSpec((tm1, f_in_p), lambda i: (i, 0)),       # x rows
                pl.BlockSpec((f_in_p, f_out_p), lambda i: (0, 0)),   # weight
            ],
            out_specs=pl.BlockSpec((tm1, f_out_p), lambda i: (i, 0)),
        ),
        compiler_params=pltpu.CompilerParams(
            dimension_semantics=("parallel",),
            vmem_limit_bytes=vmem_limit,
        ),
    )(xp, wp)

    # ---- kernel 2: out = adj @ support + bias (K-tiled, o_ref accumulates) ---
    if support_resident:
        support_spec = pl.BlockSpec((np_, tn), lambda i, j, k: (0, j))
    else:
        support_spec = pl.BlockSpec((t, tn), lambda i, j, k: (k, j))

    kernel2 = functools.partial(
        _adj_matmul_bias_kernel, tk=t, cdt=cdt,
        cast_adj=(jnp.dtype(adj.dtype) != cdt),
        support_resident=support_resident)

    out_p = pl.pallas_call(
        kernel2,
        out_shape=jax.ShapeDtypeStruct((np_, f_out_p), jnp.float32),
        grid_spec=pltpu.PrefetchScalarGridSpec(
            num_scalar_prefetch=0,
            grid=(np_ // t, f_out_p // tn, np_ // t),   # reduction axis last
            in_specs=[
                pl.BlockSpec((t, t), lambda i, j, k: (i, k)),    # adj tile
                support_spec,                                    # support
                pl.BlockSpec((1, tn), lambda i, j, k: (0, j)),   # bias slab
            ],
            out_specs=pl.BlockSpec((t, tn), lambda i, j, k: (i, j)),
        ),
        compiler_params=pltpu.CompilerParams(
            dimension_semantics=("parallel", "parallel", "arbitrary"),
            vmem_limit_bytes=vmem_limit,
        ),
    )(adjp, support, bp)

    return out_p[:N, :f_out]


def reference(x, adj, weight, bias):
    return adj @ (x @ weight) + bias[None, :]


if __name__ == "__main__":
    # Small deterministic example: 256 nodes, 64 -> 128 features.
    N, F_IN, F_OUT = 256, 64, 128

    key = jax.random.PRNGKey(0)
    k_x, k_adj, k_w, k_b = jax.random.split(key, 4)

    x = jax.random.normal(k_x, (N, F_IN), dtype=jnp.float32)

    # Synthetic (dense) row-normalized adjacency with self-loops.
    a = (jax.random.uniform(k_adj, (N, N)) < 0.05).astype(jnp.float32)
    a = a + jnp.eye(N, dtype=jnp.float32)
    deg = jnp.sum(a, axis=1, keepdims=True)
    adj = a / deg

    # Parameters initialized as in reset_parameters(): U(-stdv, stdv),
    # stdv = 1 / sqrt(out_features).
    stdv = 1.0 / math.sqrt(F_OUT)
    weight = jax.random.uniform(k_w, (F_IN, F_OUT), minval=-stdv, maxval=stdv,
                                dtype=jnp.float32)
    bias = jax.random.uniform(k_b, (F_OUT,), minval=-stdv, maxval=stdv,
                              dtype=jnp.float32)

    ref = reference(x, adj, weight, bias)

    # Exact f32 path (comparable to the reference up to f32 rounding).
    out_f32 = jax.block_until_ready(
        graph_convolution(x, adj, weight, bias, compute_dtype=jnp.float32))
    assert out_f32.shape == (N, F_OUT)
    assert jnp.allclose(out_f32, ref, atol=1e-4, rtol=1e-4)

    # Default fast path: bf16 MXU inputs (adj cast in-kernel), f32 accumulation.
    out = jax.block_until_ready(graph_convolution(x, adj, weight, bias))
    assert out.shape == (N, F_OUT)
    assert jnp.allclose(out, ref, atol=3e-2, rtol=3e-2)

    print("KERNEL_OK")
</pallas_src>

<mosaic_0001>
module attributes {stable_mosaic.version = 11 : i64} {
  func.func @_xw_kernel(%arg0: i32, %arg1: memref<256x128xf32, #tpu.memory_space<vmem>>, %arg2: memref<128x128xf32, #tpu.memory_space<vmem>>, %arg3: memref<256x128xf32, #tpu.memory_space<vmem>>) attributes {dimension_semantics = [#tpu.dimension_semantics<parallel>], iteration_bounds = array<i64: 1>, scalar_prefetch = 0 : i64, scratch_operands = 0 : i64, tpu.core_type = #tpu.core_type<tc>, window_params = [{transform_indices = @transform_0, window_bounds = array<i64: 256, 128>}, {pipeline_mode = #tpu.pipeline_mode<synchronous>, transform_indices = @transform_1, window_bounds = array<i64: 128, 128>}, {transform_indices = @transform_2, window_bounds = array<i64: 256, 128>}]} {
    %c0 = arith.constant 0 : index
    %c0_0 = arith.constant 0 : index
    %0 = vector.load %arg1[%c0, %c0_0] : memref<256x128xf32, #tpu.memory_space<vmem>>, vector<256x128xf32>
    %c0_1 = arith.constant 0 : index
    %c0_2 = arith.constant 0 : index
    %1 = vector.load %arg2[%c0_1, %c0_2] : memref<128x128xf32, #tpu.memory_space<vmem>>, vector<128x128xf32>
    %cst = arith.constant dense<0.000000e+00> : vector<256x128xf32>
    %2 = tpu.matmul %0, %1, %cst {dimension_numbers = #tpu.dot_dimension_numbers<[1], [0], [0], [1], [0, 0, 1, 1], [], []>} : vector<256x128xf32>, vector<128x128xf32>, vector<256x128xf32> -> vector<256x128xf32>
    %c0_3 = arith.constant 0 : index
    %c0_4 = arith.constant 0 : index
    %3 = vector.load %arg3[%c0_3, %c0_4] : memref<256x128xf32, #tpu.memory_space<vmem>>, vector<256x128xf32>
    tpu.vector_store %arg3[%c0_3, %c0_4], %2 {strides = array<i32>} : memref<256x128xf32, #tpu.memory_space<vmem>>, vector<256x128xf32>,
    return
  }
  func.func @transform_0(%arg0: i32) -> (i32, i32) {
    %c0_i32 = arith.constant 0 : i32
    %c0_i32_0 = arith.constant 0 : i32
    return %arg0, %c0_i32 : i32, i32
  }
  func.func @transform_1(%arg0: i32) -> (i32, i32) {
    %c0_i32 = arith.constant 0 : i32
    %c0_i32_0 = arith.constant 0 : i32
    %c0_i32_1 = arith.constant 0 : i32
    return %c0_i32, %c0_i32_0 : i32, i32
  }
  func.func @transform_2(%arg0: i32) -> (i32, i32) {
    %c0_i32 = arith.constant 0 : i32
    %c0_i32_0 = arith.constant 0 : i32
    return %arg0, %c0_i32 : i32, i32
  }
}

</mosaic_0001>

<bundles_post_ra>
// kernel: tpu_custom_call.1
= control target key start
LH: loop header
LB: loop body
LE: loop exit
PB: predicated region body
PF: predicated region fallthrough
CT: control target
= control target key end

     0   :  { %7 = vsyncpa [#allocation3], 0  ;;  %s426_s0 = inlined_call_operand.hbm [shape: f32[256,128], index: 0, kind: input, shape index: {}]   ;;  %s427_s1 = inlined_call_operand.hbm [shape: f32[128,128], index: 1, kind: input, shape index: {}]   ;;  %s428_s2 = inlined_call_operand.hbm [shape: f32[256,128], index: 2, kind: output, shape index: {}]  }
   0x1   :  { %8 = vsyncpa [#allocation6], 0 }
   0x2   :  { %9 = vsyncpa [#allocation4], 0  ;;  %s14_s11 = sshll.u32 %s426_s0, 4  ;;  %s388_s12 = smov [#allocation2]   ;;  %s15_s11 = int_to_ptr.hbm [resolvable:$true] %s14_s11 }
   0x3   :  { %s16_s13 = sshll.u32 %s388_s12, 4  ;;  %s27_s16 = sshll.u32 %s427_s1, 4  ;;  %s17_s13 = int_to_ptr.vmem [resolvable:$true] %s16_s13  ;;  %s28_s16 = int_to_ptr.hbm [resolvable:$true] %s27_s16 }
   0x4   :  { %s389_s17 = smov 128   ;;  %s390_s18 = smov 8  }
   0x5   :  { %22 = dma.hbm_to_vmem [thread:$0]  %s15_s11, 4096, %s17_s13, [#allocation3], %s389_s17, %s389_s17, %s390_s18  }
   0x6   :  { %s391_s19 = smov [#allocation5]  }
   0x7   :  { %s29_s20 = sshll.u32 %s391_s19, 4  ;;  %s30_s20 = int_to_ptr.vmem [resolvable:$true] %s29_s20 }
   0x8   :  { %35 = dma.hbm_to_vmem [thread:$0]  %s28_s16, 2048, %s30_s20, [#allocation6], %s389_s17, %s389_s17, %s390_s18  }
   0x9   :  { %382 = dma.done.wait [#allocation3], 4096  }
   0xa   :  { %383 = vsyncadd [#allocation3], 4294963200 }
   0xb   :  { %384 = dma.done.wait [#allocation6], 2048  }
   0xc   :  { %385 = vsyncadd [#allocation6], 4294965248  ;;  %v91_v0 = vld [vmem:[#allocation5 + $0x78] sm:$0xff]  ;;  %v90_v1 = vld [vmem:[#allocation5 + $0x70] sm:$0xff]  ;;  %s392_s0 = smov [#allocation7]   ;;  %s243_s23 = sshll.u32 %s428_s2, 4  ;;  %s244_s23 = int_to_ptr.hbm [resolvable:$true] %s243_s23 }
   0xd   :  { %258 = vmatpush.msra.mxu2 %v91_v0  ;;  %259 = vmatpush.msra.mxu3 %v91_v0  ;;  %v89_v2 = vld [vmem:[#allocation5 + $0x68] sm:$0xff]  ;;  %v88_v3 = vld [vmem:[#allocation5 + $0x60] sm:$0xff]  ;;  %v87_v4 = vld [vmem:[#allocation5 + $0x58] sm:$0xff]  ;;  %s241_s1 = sshll.u32 %s392_s0, 4  ;;  %s242_s1 = int_to_ptr.vmem [resolvable:$true] %s241_s1 }
   0xe   :  { %92 = vmatpush.msra.mxu0 %v91_v0  ;;  %257 = vmatpush.msra.mxu1 %v91_v0  ;;  %v86_v5 = vld [vmem:[#allocation5 + $0x50] sm:$0xff]  ;;  %v85_v6 = vld [vmem:[#allocation5 + $0x48] sm:$0xff]  ;;  %v84_v7 = vld [vmem:[#allocation5 + $0x40] sm:$0xff] }
   0xf   :  { %261 = vmatpush.msra.mxu2 %v90_v1  ;;  %262 = vmatpush.msra.mxu3 %v90_v1  ;;  %v83_v8 = vld [vmem:[#allocation5 + $0x38] sm:$0xff]  ;;  %v82_v9 = vld [vmem:[#allocation5 + $0x30] sm:$0xff]  ;;  %v81_v10 = vld [vmem:[#allocation5 + $0x28] sm:$0xff] }
  0x10   :  { %93 = vmatpush.msra.mxu0 %v90_v1  ;;  %260 = vmatpush.msra.mxu1 %v90_v1  ;;  %v80_v11 = vld [vmem:[#allocation5 + $0x20] sm:$0xff]  ;;  %v79_v12 = vld [vmem:[#allocation5 + $0x18] sm:$0xff]  ;;  %v78_v13 = vld [vmem:[#allocation5 + $0x10] sm:$0xff] }
  0x11   :  { %264 = vmatpush.msra.mxu2 %v89_v2  ;;  %265 = vmatpush.msra.mxu3 %v89_v2  ;;  %v77_v14 = vld [vmem:[#allocation5 + $0x8] sm:$0xff]  ;;  %v76_v15 = vld [vmem:[#allocation5] sm:$0xff]  ;;  %v62_v24 = vld [vmem:[#allocation2 + $0x90] sm:$0xff] }
  0x12   :  { %94 = vmatpush.msra.mxu0 %v89_v2  ;;  %263 = vmatpush.msra.mxu1 %v89_v2  ;;  %v60_v16 = vld [vmem:[#allocation2 + $0x80] sm:$0xff]  ;;  %v61_v20 = vld [vmem:[#allocation2 + $0x88] sm:$0xff]  ;;  %v70_v25 = vld [vmem:[#allocation2 + $0xd0] sm:$0xff] }
  0x13   :  { %267 = vmatpush.msra.mxu2 %v88_v3  ;;  %268 = vmatpush.msra.mxu3 %v88_v3  ;;  %v68_v17 = vld [vmem:[#allocation2 + $0xc0] sm:$0xff]  ;;  %v69_v21 = vld [vmem:[#allocation2 + $0xc8] sm:$0xff]  ;;  %v46_v26 = vld [vmem:[#allocation2 + $0x10] sm:$0xff] }
  0x14   :  { %95 = vmatpush.msra.mxu0 %v88_v3  ;;  %266 = vmatpush.msra.mxu1 %v88_v3  ;;  %v44_v18 = vld [vmem:[#allocation2] sm:$0xff]  ;;  %v45_v22 = vld [vmem:[#allocation2 + $0x8] sm:$0xff]  ;;  %v54_v27 = vld [vmem:[#allocation2 + $0x50] sm:$0xff] }
  0x15   :  { %270 = vmatpush.msra.mxu2 %v87_v4  ;;  %271 = vmatpush.msra.mxu3 %v87_v4  ;;  %v52_v19 = vld [vmem:[#allocation2 + $0x40] sm:$0xff]  ;;  %v53_v23 = vld [vmem:[#allocation2 + $0x48] sm:$0xff]  ;;  %v63_v28 = vld [vmem:[#allocation2 + $0x98] sm:$0xff] }
  0x16   :  { %96 = vmatpush.msra.mxu0 %v87_v4  ;;  %269 = vmatpush.msra.mxu1 %v87_v4  ;;  %v71_v29 = vld [vmem:[#allocation2 + $0xd8] sm:$0xff]  ;;  %v64_v32 = vld [vmem:[#allocation2 + $0xa0] sm:$0xff]  ;;  %v65_v36 = vld [vmem:[#allocation2 + $0xa8] sm:$0xff] }
  0x17   :  { %273 = vmatpush.msra.mxu2 %v86_v5  ;;  %274 = vmatpush.msra.mxu3 %v86_v5  ;;  %v47_v30 = vld [vmem:[#allocation2 + $0x18] sm:$0xff]  ;;  %v72_v33 = vld [vmem:[#allocation2 + $0xe0] sm:$0xff]  ;;  %v73_v37 = vld [vmem:[#allocation2 + $0xe8] sm:$0xff] }
  0x18   :  { %97 = vmatpush.msra.mxu0 %v86_v5  ;;  %272 = vmatpush.msra.mxu1 %v86_v5  ;;  %v55_v31 = vld [vmem:[#allocation2 + $0x58] sm:$0xff]  ;;  %v48_v34 = vld [vmem:[#allocation2 + $0x20] sm:$0xff]  ;;  %v49_v38 = vld [vmem:[#allocation2 + $0x28] sm:$0xff] }
  0x19   :  { %276 = vmatpush.msra.mxu2 %v85_v6  ;;  %277 = vmatpush.msra.mxu3 %v85_v6  ;;  %v56_v35 = vld [vmem:[#allocation2 + $0x60] sm:$0xff]  ;;  %v57_v39 = vld [vmem:[#allocation2 + $0x68] sm:$0xff]  ;;  %v66_v40 = vld [vmem:[#allocation2 + $0xb0] sm:$0xff] }
  0x1a   :  { %98 = vmatpush.msra.mxu0 %v85_v6  ;;  %275 = vmatpush.msra.mxu1 %v85_v6  ;;  %v74_v41 = vld [vmem:[#allocation2 + $0xf0] sm:$0xff]  ;;  %v67_v44 = vld [vmem:[#allocation2 + $0xb8] sm:$0xff] }
  0x1b   :  { %279 = vmatpush.msra.mxu2 %v84_v7  ;;  %280 = vmatpush.msra.mxu3 %v84_v7  ;;  %v50_v42 = vld [vmem:[#allocation2 + $0x30] sm:$0xff]  ;;  %v75_v45 = vld [vmem:[#allocation2 + $0xf8] sm:$0xff] }
  0x1c   :  { %99 = vmatpush.msra.mxu0 %v84_v7  ;;  %278 = vmatpush.msra.mxu1 %v84_v7  ;;  %v58_v43 = vld [vmem:[#allocation2 + $0x70] sm:$0xff]  ;;  %v51_v46 = vld [vmem:[#allocation2 + $0x38] sm:$0xff] }
  0x1d   :  { %282 = vmatpush.msra.mxu2 %v83_v8  ;;  %283 = vmatpush.msra.mxu3 %v83_v8  ;;  %v59_v47 = vld [vmem:[#allocation2 + $0x78] sm:$0xff] }
  0x1e   :  { %100 = vmatpush.msra.mxu0 %v83_v8  ;;  %281 = vmatpush.msra.mxu1 %v83_v8 }
  0x1f   :  { %285 = vmatpush.msra.mxu2 %v82_v9  ;;  %286 = vmatpush.msra.mxu3 %v82_v9 }
  0x20   :  { %101 = vmatpush.msra.mxu0 %v82_v9  ;;  %284 = vmatpush.msra.mxu1 %v82_v9 }
  0x21   :  { %288 = vmatpush.msra.mxu2 %v81_v10  ;;  %289 = vmatpush.msra.mxu3 %v81_v10 }
  0x22   :  { %102 = vmatpush.msra.mxu0 %v81_v10  ;;  %287 = vmatpush.msra.mxu1 %v81_v10 }
  0x23   :  { %291 = vmatpush.msra.mxu2 %v80_v11  ;;  %292 = vmatpush.msra.mxu3 %v80_v11 }
  0x24   :  { %103 = vmatpush.msra.mxu0 %v80_v11  ;;  %290 = vmatpush.msra.mxu1 %v80_v11 }
  0x25   :  { %294 = vmatpush.msra.mxu2 %v79_v12  ;;  %295 = vmatpush.msra.mxu3 %v79_v12 }
  0x26   :  { %104 = vmatpush.msra.mxu0 %v79_v12  ;;  %293 = vmatpush.msra.mxu1 %v79_v12 }
  0x27   :  { %297 = vmatpush.msra.mxu2 %v78_v13  ;;  %298 = vmatpush.msra.mxu3 %v78_v13 }
  0x28   :  { %105 = vmatpush.msra.mxu0 %v78_v13  ;;  %296 = vmatpush.msra.mxu1 %v78_v13 }
  0x29   :  { %300 = vmatpush.msra.mxu2 %v77_v14  ;;  %301 = vmatpush.msra.mxu3 %v77_v14 }
  0x2a   :  { %106 = vmatpush.msra.mxu0 %v77_v14  ;;  %299 = vmatpush.msra.mxu1 %v77_v14 }
  0x2b   :  { %303 = vmatpush.msra.mxu2 %v76_v15  ;;  %304 = vmatpush.msra.mxu3 %v76_v15 }
  0x2c   :  { %156 = vmatmul.f32.vlgmr.msra.gmra.mxu2 %v60_v16  ;;  %180 = vmatmul.f32.vlgmr.msra.gmra.mxu3 %v68_v17 }
  0x2d   :  { %107 = vmatpush.msra.mxu0 %v76_v15  ;;  %302 = vmatpush.msra.mxu1 %v76_v15 }
  0x2e   :  { %108 = vmatmul.f32.vlgmr.msra.gmra.mxu0 %v44_v18  ;;  %132 = vmatmul.f32.vlgmr.msra.gmra.mxu1 %v52_v19 }
  0x34   :  { %159 = vmatmul.f32.gmra.mxu2 %v61_v20  ;;  %183 = vmatmul.f32.gmra.mxu3 %v69_v21 }
  0x36   :  { %111 = vmatmul.f32.gmra.mxu0 %v45_v22  ;;  %135 = vmatmul.f32.gmra.mxu1 %v53_v23 }
  0x3c   :  { %162 = vmatmul.f32.gmra.mxu2 %v62_v24  ;;  %186 = vmatmul.f32.gmra.mxu3 %v70_v25 }
  0x3e   :  { %114 = vmatmul.f32.gmra.mxu0 %v46_v26  ;;  %138 = vmatmul.f32.gmra.mxu1 %v54_v27 }
  0x44   :  { %165 = vmatmul.f32.gmra.mxu2 %v63_v28  ;;  %189 = vmatmul.f32.gmra.mxu3 %v71_v29 }
  0x46   :  { %117 = vmatmul.f32.gmra.mxu0 %v47_v30  ;;  %141 = vmatmul.f32.gmra.mxu1 %v55_v31 }
  0x4c   :  { %168 = vmatmul.f32.gmra.mxu2 %v64_v32  ;;  %192 = vmatmul.f32.gmra.mxu3 %v72_v33 }
  0x4e   :  { %120 = vmatmul.f32.gmra.mxu0 %v48_v34  ;;  %144 = vmatmul.f32.gmra.mxu1 %v56_v35 }
  0x54   :  { %171 = vmatmul.f32.gmra.mxu2 %v65_v36  ;;  %195 = vmatmul.f32.gmra.mxu3 %v73_v37 }
  0x56   :  { %123 = vmatmul.f32.gmra.mxu0 %v49_v38  ;;  %147 = vmatmul.f32.gmra.mxu1 %v57_v39 }
  0x5c   :  { %174 = vmatmul.f32.gmra.mxu2 %v66_v40  ;;  %198 = vmatmul.f32.gmra.mxu3 %v74_v41 }
  0x5e   :  { %126 = vmatmul.f32.gmra.mxu0 %v50_v42  ;;  %150 = vmatmul.f32.gmra.mxu1 %v58_v43 }
  0x64   :  { %177 = vmatmul.f32.gmra.mxu2 %v67_v44  ;;  %201 = vmatmul.f32.gmra.mxu3 %v75_v45 }
  0x66   :  { %129 = vmatmul.f32.gmra.mxu0 %v51_v46  ;;  %153 = vmatmul.f32.gmra.mxu1 %v59_v47 }
  0xab   :  { %v109_v48 = vpop.f32.mrf.mxu0  ;;  %v133_v49 = vpop.f32.mrf.mxu1 }
  0xac   :  { %205 = vst [vmem:[#allocation7] sm:$0xff] %v109_v48 }
  0xad   :  { %213 = vst [vmem:[#allocation7 + $0x40] sm:$0xff] %v133_v49 }
  0xaf   :  { %v157_v50 = vpop.f32.mrf.mxu2  ;;  %v181_v51 = vpop.f32.mrf.mxu3 }
  0xb0   :  { %221 = vst [vmem:[#allocation7 + $0x80] sm:$0xff] %v157_v50 }
  0xb1   :  { %229 = vst [vmem:[#allocation7 + $0xc0] sm:$0xff] %v181_v51 }
  0xb3   :  { %v112_v52 = vpop.f32.mrf.mxu0  ;;  %v136_v53 = vpop.f32.mrf.mxu1 }
  0xb4   :  { %206 = vst [vmem:[#allocation7 + $0x8] sm:$0xff] %v112_v52 }
  0xb5   :  { %214 = vst [vmem:[#allocation7 + $0x48] sm:$0xff] %v136_v53 }
  0xb7   :  { %v160_v54 = vpop.f32.mrf.mxu2  ;;  %v184_v55 = vpop.f32.mrf.mxu3 }
  0xb8   :  { %222 = vst [vmem:[#allocation7 + $0x88] sm:$0xff] %v160_v54 }
  0xb9   :  { %230 = vst [vmem:[#allocation7 + $0xc8] sm:$0xff] %v184_v55 }
  0xbb   :  { %v115_v56 = vpop.f32.mrf.mxu0  ;;  %v139_v57 = vpop.f32.mrf.mxu1 }
  0xbc   :  { %207 = vst [vmem:[#allocation7 + $0x10] sm:$0xff] %v115_v56 }
  0xbd   :  { %215 = vst [vmem:[#allocation7 + $0x50] sm:$0xff] %v139_v57 }
  0xbf   :  { %v163_v58 = vpop.f32.mrf.mxu2  ;;  %v187_v59 = vpop.f32.mrf.mxu3 }
  0xc0   :  { %223 = vst [vmem:[#allocation7 + $0x90] sm:$0xff] %v163_v58 }
  0xc1   :  { %231 = vst [vmem:[#allocation7 + $0xd0] sm:$0xff] %v187_v59 }
  0xc3   :  { %v118_v60 = vpop.f32.mrf.mxu0  ;;  %v142_v61 = vpop.f32.mrf.mxu1 }
  0xc4   :  { %208 = vst [vmem:[#allocation7 + $0x18] sm:$0xff] %v118_v60 }
  0xc5   :  { %216 = vst [vmem:[#allocation7 + $0x58] sm:$0xff] %v142_v61 }
  0xc7   :  { %v166_v62 = vpop.f32.mrf.mxu2  ;;  %v190_v63 = vpop.f32.mrf.mxu3 }
  0xc8   :  { %224 = vst [vmem:[#allocation7 + $0x98] sm:$0xff] %v166_v62 }
  0xc9   :  { %232 = vst [vmem:[#allocation7 + $0xd8] sm:$0xff] %v190_v63 }
  0xcb   :  { %v121_v0 = vpop.f32.mrf.mxu0  ;;  %v145_v1 = vpop.f32.mrf.mxu1 }
  0xcc   :  { %209 = vst [vmem:[#allocation7 + $0x20] sm:$0xff] %v121_v0 }
  0xcd   :  { %217 = vst [vmem:[#allocation7 + $0x60] sm:$0xff] %v145_v1 }
  0xcf   :  { %v169_v2 = vpop.f32.mrf.mxu2  ;;  %v193_v3 = vpop.f32.mrf.mxu3 }
  0xd0   :  { %225 = vst [vmem:[#allocation7 + $0xa0] sm:$0xff] %v169_v2 }
  0xd1   :  { %233 = vst [vmem:[#allocation7 + $0xe0] sm:$0xff] %v193_v3 }
  0xd3   :  { %v124_v4 = vpop.f32.mrf.mxu0  ;;  %v148_v5 = vpop.f32.mrf.mxu1 }
  0xd4   :  { %210 = vst [vmem:[#allocation7 + $0x28] sm:$0xff] %v124_v4 }
  0xd5   :  { %218 = vst [vmem:[#allocation7 + $0x68] sm:$0xff] %v148_v5 }
  0xd7   :  { %v172_v6 = vpop.f32.mrf.mxu2  ;;  %v196_v7 = vpop.f32.mrf.mxu3 }
  0xd8   :  { %226 = vst [vmem:[#allocation7 + $0xa8] sm:$0xff] %v172_v6 }
  0xd9   :  { %234 = vst [vmem:[#allocation7 + $0xe8] sm:$0xff] %v196_v7 }
  0xdb   :  { %v127_v8 = vpop.f32.mrf.mxu0  ;;  %v151_v9 = vpop.f32.mrf.mxu1 }
  0xdc   :  { %211 = vst [vmem:[#allocation7 + $0x30] sm:$0xff] %v127_v8 }
  0xdd   :  { %219 = vst [vmem:[#allocation7 + $0x70] sm:$0xff] %v151_v9 }
  0xdf   :  { %v175_v10 = vpop.f32.mrf.mxu2  ;;  %v199_v11 = vpop.f32.mrf.mxu3 }
  0xe0   :  { %227 = vst [vmem:[#allocation7 + $0xb0] sm:$0xff] %v175_v10 }
  0xe1   :  { %235 = vst [vmem:[#allocation7 + $0xf0] sm:$0xff] %v199_v11 }
  0xe3   :  { %v130_v12 = vpop.f32.mrf.mxu0  ;;  %v154_v13 = vpop.f32.mrf.mxu1 }
  0xe4   :  { %212 = vst [vmem:[#allocation7 + $0x38] sm:$0xff] %v130_v12 }
  0xe5   :  { %220 = vst [vmem:[#allocation7 + $0x78] sm:$0xff] %v154_v13 }
  0xe7   :  { %v178_v14 = vpop.f32.mrf.mxu2  ;;  %v202_v15 = vpop.f32.mrf.mxu3 }
  0xe8   :  { %228 = vst [vmem:[#allocation7 + $0xb8] sm:$0xff] %v178_v14 }
  0xe9   :  { %236 = vst [vmem:[#allocation7 + $0xf8] sm:$0xff] %v202_v15 }
  0xea   :  { %249 = dma.vmem_to_hbm [thread:$0]  %s242_s1, 4096, %s244_s23, [#allocation4], %s389_s17, %s389_s17, %s390_s18  }
  0xeb   :  { %386 = dma.done.wait [#allocation4], 4096  }
  0xec   :  { %387 = vsyncadd [#allocation4], 4294963200 }
  0xed   :  { %254 = vsyncpa [#allocation3], 1 }
  0xee   :  { %255 = vsyncpa [#allocation6], 1 }
  0xef   :  { %256 = vsyncpa [#allocation4], 1 }

</bundles_post_ra>
